<compile_context>
chip_gen: v7x
topology: tpu7x:2x2x1
jax: 0.10.0
libtpu: 0.0.40
codegen_flags: <defaults>
</compile_context>

<pallas_src>
import jax
import jax.numpy as jnp
from jax.experimental import pallas as pl
from jax.experimental.pallas import tpu as pltpu


def _copy_kernel(x_ref, o_ref):
    # Pure pass-through of the current (row_block, lane) tile.
    o_ref[...] = x_ref[...]


_MAX_LANES = 4096                 # cap on the lane (last) dim of a copy block
_BLOCK_BYTES = 2 * 1024 * 1024    # ~2 MiB/block -> <= 8 MiB live (in+out, 2x buffered)


def _sublane_multiple(itemsize):
    # f32 -> 8 rows per packed tile; bf16 -> 16; int8/fp8 -> 32.
    return max(8, 32 // max(1, itemsize))


def _candidate_lanes(total):
    """Multiples of 128 that divide `total`, largest first, capped at _MAX_LANES."""
    lanes = []
    lane = 128
    while lane <= min(_MAX_LANES, total):
        if total % lane == 0:
            lanes.append(lane)
        lane += 128
    return lanes[::-1]


def _pick_row_block(rows, lane, itemsize):
    """Largest VMEM-budgeted row block: divisor of `rows`, sublane multiple."""
    max_rows = max(1, _BLOCK_BYTES // (lane * itemsize))
    if rows <= max_rows:
        return rows  # full extent on the sublane axis is always layout-legal
    sub = _sublane_multiple(itemsize)
    best = None
    cand = sub
    while cand <= max_rows:
        if rows % cand == 0:
            best = cand
        cand += sub
    return best


def _plan_copy(total, itemsize):
    """Pick (lane, rows, row_block) for a lane-dense tiled memcpy, or None."""
    for lane in _candidate_lanes(total):
        rows = total // lane
        row_block = _pick_row_block(rows, lane, itemsize)
        if row_block is not None:
            return lane, rows, row_block
    return None


def _materialized_copy(x_flat, row_block):
    """Identity copy of a lane-dense (rows, lane) array via a tiled Pallas memcpy."""
    rows, lane = x_flat.shape
    grid = (rows // row_block,)
    return pl.pallas_call(
        _copy_kernel,
        out_shape=jax.ShapeDtypeStruct((rows, lane), x_flat.dtype),
        grid=grid,
        in_specs=[pl.BlockSpec((row_block, lane), lambda i: (i, 0))],
        out_specs=pl.BlockSpec((row_block, lane), lambda i: (i, 0)),
        compiler_params=pltpu.CompilerParams(
            dimension_semantics=("parallel",),
            vmem_limit_bytes=32 * 1024 * 1024,
        ),
    )(x_flat)


def reshape_layer(x, shape: int, *, materialize: bool = False):
    """Equivalent of PyTorch `x.view(-1, shape)`.

    Args:
      x: any-rank array whose total element count is divisible by `shape`.
      shape: target last-dimension size (the `self.shape` of ReshapeLayer).
      materialize: if True, force a materialized copy through a Pallas kernel;
        otherwise return the metadata-only reshape (recommended, zero traffic).
    """
    total = x.size
    assert total % shape == 0, "total elements must be divisible by `shape`"
    n_rows = total // shape

    if not materialize:
        # Metadata-only, exactly like torch contiguous .view().
        return jnp.reshape(x, (n_rows, shape))

    # Lane-dense factorization for the copy (independent of the logical view).
    plan = _plan_copy(total, jnp.dtype(x.dtype).itemsize)
    if plan is None:
        # No multiple-of-128 factorization; a masked-store copy isn't worth it.
        return jnp.reshape(x, (n_rows, shape))
    lane, rows, row_block = plan

    x_flat = jnp.reshape(x, (rows, lane))
    out_flat = _materialized_copy(x_flat, row_block)
    return jnp.reshape(out_flat, (n_rows, shape))


if __name__ == "__main__":
    k1, k2 = jax.random.split(jax.random.PRNGKey(0))

    # NCHW input, as a PyTorch conv-style tensor would be.
    B, C, H, W = 2, 4, 16, 16
    shape = 32  # ReshapeLayer(shape=32)
    x = jax.random.normal(k1, (B, C, H, W), dtype=jnp.float32)

    # Reference: row-major reshape (== torch .view(-1, shape) on contiguous x).
    y_ref = jnp.reshape(x, (-1, shape))

    # Default metadata-only path.
    y_view = jax.block_until_ready(reshape_layer(x, shape))
    assert y_view.shape == (B * C * H * W // shape, shape), y_view.shape
    assert y_view.dtype == x.dtype
    assert bool(jnp.array_equal(y_view, y_ref))

    # Materialized Pallas-copy path (small input -> single lane-dense block).
    y_copy = jax.block_until_ready(reshape_layer(x, shape, materialize=True))
    assert y_copy.shape == y_ref.shape and y_copy.dtype == x.dtype
    assert bool(jnp.array_equal(y_copy, y_ref))

    # Larger input to exercise the multi-step, pipelined, parallel grid
    # (total=2^21 f32 -> lane=4096, rows=512, row_block=128 -> grid=(4,)).
    x_big = jax.random.normal(k2, (2, 4, 512, 512), dtype=jnp.float32)
    y_big_ref = jnp.reshape(x_big, (-1, shape))
    y_big = jax.block_until_ready(reshape_layer(x_big, shape, materialize=True))
    assert y_big.shape == y_big_ref.shape and y_big.dtype == x_big.dtype
    assert bool(jnp.array_equal(y_big, y_big_ref))

    # bf16 input (exercises the dtype-aware sublane multiple in block planning).
    x_bf16 = x_big.astype(jnp.bfloat16)
    y_bf16 = jax.block_until_ready(reshape_layer(x_bf16, shape, materialize=True))
    assert bool(jnp.array_equal(y_bf16, jnp.reshape(x_bf16, (-1, shape))))

    print("KERNEL_OK")
</pallas_src>

<mosaic_0001>
module attributes {stable_mosaic.version = 11 : i64} {
  func.func @_copy_kernel(%arg0: i32, %arg1: memref<1x2048xf32, #tpu.memory_space<vmem>>, %arg2: memref<1x2048xf32, #tpu.memory_space<vmem>>) attributes {dimension_semantics = [#tpu.dimension_semantics<parallel>], iteration_bounds = array<i64: 1>, scalar_prefetch = 0 : i64, scratch_operands = 0 : i64, tpu.core_type = #tpu.core_type<tc>, window_params = [{transform_indices = @transform_0, window_bounds = array<i64: 1, 2048>}, {transform_indices = @transform_1, window_bounds = array<i64: 1, 2048>}]} {
    %c0 = arith.constant 0 : index
    %c0_0 = arith.constant 0 : index
    %0 = vector.load %arg1[%c0, %c0_0] : memref<1x2048xf32, #tpu.memory_space<vmem>>, vector<1x2048xf32>
    %c0_1 = arith.constant 0 : index
    %c0_2 = arith.constant 0 : index
    %1 = vector.load %arg2[%c0_1, %c0_2] : memref<1x2048xf32, #tpu.memory_space<vmem>>, vector<1x2048xf32>
    tpu.vector_store %arg2[%c0_1, %c0_2], %0 {strides = array<i32>} : memref<1x2048xf32, #tpu.memory_space<vmem>>, vector<1x2048xf32>,
    return
  }
  func.func @transform_0(%arg0: i32) -> (i32, i32) {
    %c0_i32 = arith.constant 0 : i32
    %c0_i32_0 = arith.constant 0 : i32
    return %arg0, %c0_i32 : i32, i32
  }
  func.func @transform_1(%arg0: i32) -> (i32, i32) {
    %c0_i32 = arith.constant 0 : i32
    %c0_i32_0 = arith.constant 0 : i32
    return %arg0, %c0_i32 : i32, i32
  }
}

</mosaic_0001>

<bundles_post_ra>
// kernel: tpu_custom_call.1
= control target key start
LH: loop header
LB: loop body
LE: loop exit
PB: predicated region body
PF: predicated region fallthrough
CT: control target
= control target key end

     0   :  { %6 = vsyncpa [#allocation3], 0  ;;  %s126_s0 = inlined_call_operand.hbm [shape: f32[1,2048], index: 0, kind: input, shape index: {}]   ;;  %s127_s1 = inlined_call_operand.hbm [shape: f32[1,2048], index: 1, kind: output, shape index: {}]  }
   0x1   :  { %7 = vsyncpa [#allocation4], 0  ;;  %s90_s6 = smov [#allocation2]   ;;  %s42_s10 = scalar_lea.hbm %s126_s0, 256 }
   0x2   :  { %s14_s7 = sshll.u32 %s90_s6, 4  ;;  %p43_p0 = scmp.ne.s32.totalorder %s126_s0, %s42_s10  ;;  %s15_s7 = int_to_ptr.vmem [resolvable:$true] %s14_s7 }
   0x3   :  { %p46_p1 = scmp.lt.u32.totalorder %s42_s10, %s126_s0 }
   0x5   :  { %p48_p2 = pnand %p46_p1, %p43_p0 }
   0x7   :  { %51 = shalt.err (!%p48_p2)
}
   0x8   :  { %s52_s15 = scalar_lea.vmem %s15_s7, 256  ;;  %p57_p4 = scmp.lt.s32.totalorder %s15_s7, %s15_s7 }
   0x9   :  { %p53_p3 = scmp.ne.s32.totalorder %s15_s7, %s52_s15  ;;  %p58_p5 = scmp.lt.s32.totalorder %s52_s15, %s52_s15 }
   0xb   :  { %p59_p6 = por %p58_p5, %p57_p4 }
   0xd   :  { %p60_p7 = pnand %p59_p6, %p53_p3 }
   0xf   :  { %63 = shalt.err (!%p60_p7)
}
  0x10   :  { %17 = dma.hbm_to_vmem [thread:$0]  %s126_s0, 256, %s15_s7, [#allocation3]  }
  0x11   :  { %86 = dma.done.wait [#allocation3], 256  }
  0x12   :  { %87 = vsyncadd [#allocation3], 4294967040  ;;  %s91_s18 = smov [#allocation5]   ;;  %v21_v0 = vld [vmem:[#allocation2] sm:$0xff]  ;;  %v22_v1 = vld [vmem:[#allocation2 + $0x8] sm:$0xff] }
  0x13   :  { %s31_s19 = sshll.u32 %s91_s18, 4  ;;  %23 = vst [vmem:[#allocation5] sm:$0xff] %v21_v0  ;;  %24 = vst [vmem:[#allocation5 + $0x8] sm:$0xff] %v22_v1  ;;  %s32_s19 = int_to_ptr.vmem [resolvable:$true] %s31_s19 }
  0x14   :  { %s64_s20 = scalar_lea.vmem %s32_s19, 256  ;;  %p69_p9 = scmp.lt.s32.totalorder %s32_s19, %s32_s19 }
  0x15   :  { %p65_p8 = scmp.ne.s32.totalorder %s32_s19, %s64_s20  ;;  %p70_p10 = scmp.lt.s32.totalorder %s64_s20, %s64_s20 }
  0x17   :  { %p71_p11 = por %p70_p10, %p69_p9 }
  0x19   :  { %p72_p12 = pnand %p71_p11, %p65_p8 }
  0x1b   :  { %75 = shalt.err (!%p72_p12)
}
  0x1c   :  { %s76_s0 = scalar_lea.hbm %s127_s1, 256 }
  0x1d   :  { %p77_p13 = scmp.ne.s32.totalorder %s127_s1, %s76_s0  ;;  %p80_p0 = scmp.lt.u32.totalorder %s76_s0, %s127_s1 }
  0x1f   :  { %p82_p1 = pnand %p80_p0, %p77_p13 }
  0x21   :  { %85 = shalt.err (!%p82_p1)
}
  0x22   :  { %34 = dma.vmem_to_hbm [thread:$0]  %s32_s19, 256, %s127_s1, [#allocation4]  }
  0x23   :  { %88 = dma.done.wait [#allocation4], 256  }
  0x24   :  { %89 = vsyncadd [#allocation4], 4294967040 }
  0x25   :  { %38 = vsyncpa [#allocation3], 1 }
  0x26   :  { %39 = vsyncpa [#allocation4], 1 }

</bundles_post_ra>
